<compile_context>
chip_gen: v7x
topology: tpu7x:2x2x1
jax: 0.10.0
libtpu: 0.0.40
codegen_flags: <defaults>
</compile_context>

<pallas_src>
import functools
import math

import jax
import jax.numpy as jnp
from jax.experimental import pallas as pl
from jax.experimental.pallas import tpu as pltpu


def _vmem_limit_bytes():
    """Generation-aware scoped-VMEM budget (~112 MiB v5e/v6e, ~48 MiB v7x)."""
    cap = 64 * 1024 * 1024
    try:
        info = pltpu.get_tpu_info()
        cap = int(getattr(info, "vmem_capacity_bytes", cap))
    except Exception:
        pass
    return int(min(max(cap - 16 * 1024 * 1024, 32 * 1024 * 1024), 112 * 1024 * 1024))


_VMEM_LIMIT = _vmem_limit_bytes()
_HIGH = jax.lax.Precision.HIGHEST


def _elu(x):
    # ELU(alpha=1); clamp the exp argument so the discarded branch never produces inf.
    return jnp.where(x > 0, x, jnp.exp(jnp.minimum(x, 0.0)) - 1.0)


def _pick_tile(n, desired, quantum):
    """Largest tile <= desired that divides n and is a multiple of `quantum`, else n."""
    if n <= desired:
        return n
    t = (desired // quantum) * quantum
    while t >= quantum:
        if n % t == 0:
            return t
        t -= quantum
    return n


def _resident(arr):
    # whole-array block, constant index_map -> stays resident across the grid
    return pl.BlockSpec(arr.shape, lambda *_: (0, 0))


# ----------------------------------------------------------------------------
# Kernel 1/3: fused multi-head GAT attention + ELU + output dense (encoder & decoder)
#   projections (H, f_q, f_k) are hoisted out of the grid and passed in.
# ----------------------------------------------------------------------------
def gat_attn_dense_kernel(fq_ref, fk_ref, adj_ref, h_ref, w2_ref, b2_ref, o_ref,
                          *, n_heads, c_head, inv_temp):
    adj_nz = adj_ref[...] != 0                       # (tq, N) int8 mask -> bool
    h_full = h_ref[...]                              # (N, hd) keys / values, resident
    fq = fq_ref[...]                                 # (tq, n_heads) query scores
    fk = fk_ref[...]                                 # (n_heads, N) key scores, row layout
    acc = None
    for k in range(n_heads):
        raw = fq[:, k:k + 1] + fk[k:k + 1, :]        # (tq, N) sublane broadcast, no transpose
        u = jax.nn.sigmoid(raw) - 0.5
        # torch .to_sparse(): entries that are exactly zero (adj==0 for binary adj, or
        # sigmoid(raw)-0.5 rounding to 0) are dropped from the row softmax; rows with
        # all entries dropped stay zero.
        mask = adj_nz & (u != 0.0)
        e = jnp.where(mask, jnp.exp(u * inv_temp), 0.0)   # |u| < 0.5 -> no max-shift needed
        denom = jnp.sum(e, axis=1, keepdims=True)
        denom = jnp.where(denom == 0.0, 1.0, denom)
        p = e * pl.reciprocal(denom, approx=True)
        head = jnp.dot(p, h_full[:, k * c_head:(k + 1) * c_head],
                       preferred_element_type=jnp.float32)          # (tq, c_head)
        # elu(concat(heads)) @ W2 == sum_k elu(head_k) @ W2[k-th row block]
        part = jnp.dot(_elu(head), w2_ref[k * c_head:(k + 1) * c_head, :],
                       preferred_element_type=jnp.float32)
        acc = part if acc is None else acc + part
    o_ref[...] = acc + b2_ref[...]


def gat_dense_layer(x, adj_mask, w, b, v01, w2, b2, *, n_heads, tile=256, temp=1.0):
    n = x.shape[0]
    hd = w.shape[1]
    c_out = w2.shape[1]
    c_head = hd // n_heads

    # Key/query projections hoisted out of the grid (done ONCE; tiny vs O(N^2) attention).
    h = jnp.dot(x, w, precision=_HIGH) + b                     # (N, hd)
    f = jnp.dot(h, v01, precision=_HIGH)                       # (N, 2*n_heads)
    f_q = f[:, :n_heads]                                       # (N, n_heads)
    f_k = jnp.transpose(f[:, n_heads:])                        # (n_heads, N) row layout

    tq = _pick_tile(n, tile, 32)       # 32-row quantum: int8 adj sublane tiling
    grid = (n // tq,)

    kernel = functools.partial(gat_attn_dense_kernel, n_heads=n_heads,
                               c_head=c_head, inv_temp=1.0 / temp)
    return pl.pallas_call(
        kernel,
        out_shape=jax.ShapeDtypeStruct((n, c_out), jnp.float32),
        grid=grid,
        in_specs=[
            pl.BlockSpec((tq, n_heads), lambda i: (i, 0)),     # query scores, row block
            _resident(f_k),                                    # key scores (n_heads, N)
            pl.BlockSpec((tq, n), lambda i: (i, 0)),           # adjacency mask block (int8)
            _resident(h),                                      # H (N, hd) keys / values
            _resident(w2), _resident(b2),
        ],
        out_specs=pl.BlockSpec((tq, c_out), lambda i: (i, 0)),
        compiler_params=pltpu.CompilerParams(
            dimension_semantics=("parallel",),
            vmem_limit_bytes=_VMEM_LIMIT),
    )(f_q, f_k, adj_mask, h, w2, b2)


# ----------------------------------------------------------------------------
# Kernel 2: fused deconvolutioner -> per-spot [spot_mu | spot_add] slab
# ----------------------------------------------------------------------------
def deconv_kernel(z_ref, emb_ref, gam_ref, l1_ref, basis_ref, bw_ref, bb_ref,
                  awz_ref, awe_ref, ab_ref, o_ref, *, g):
    elu_z = _elu(z_ref[...])                                            # (tn, hd2)
    # beta logits: pre-reduced (belong^T @ logit_step1) block + dense(elu(Z))
    logits = (l1_ref[...]
              + jnp.dot(elu_z, bw_ref[...], preferred_element_type=jnp.float32)
              + bb_ref[...])
    m = jnp.max(logits, axis=1, keepdims=True)
    e = jnp.exp(logits - m)
    beta = e / jnp.sum(e, axis=1, keepdims=True)                        # softmax over celltypes
    # alpha = dense(elu([Z | emb])); the weight was pre-split so no lane concat is needed
    alpha = (jnp.dot(elu_z, awz_ref[...], preferred_element_type=jnp.float32)
             + jnp.dot(_elu(emb_ref[...]), awe_ref[...], preferred_element_type=jnp.float32)
             + ab_ref[...])                                             # (tn, 1)
    # two direct stores instead of materializing a lane concatenate
    o_ref[:, :g] = jnp.dot(beta, basis_ref[...], preferred_element_type=jnp.float32)
    o_ref[:, g:] = alpha + gam_ref[...]


def deconv_layer(z, emb, gamma_g, l1, basis, beta_w, beta_b, alpha_w, alpha_b, *, tile=256):
    n, hd2 = z.shape
    g = basis.shape[1]
    tn = _pick_tile(n, tile, 8)
    awz, awe = alpha_w[:hd2, :], alpha_w[hd2:, :]      # split once outside the grid
    return pl.pallas_call(
        functools.partial(deconv_kernel, g=g),
        out_shape=jax.ShapeDtypeStruct((n, 2 * g), jnp.float32),
        grid=(n // tn,),
        in_specs=[
            pl.BlockSpec((tn, hd2), lambda i: (i, 0)),
            pl.BlockSpec((tn, emb.shape[1]), lambda i: (i, 0)),
            pl.BlockSpec((tn, g), lambda i: (i, 0)),
            pl.BlockSpec((tn, l1.shape[1]), lambda i: (i, 0)),
            _resident(basis), _resident(beta_w), _resident(beta_b),
            _resident(awz), _resident(awe), _resident(alpha_b),
        ],
        out_specs=pl.BlockSpec((tn, 2 * g), lambda i: (i, 0)),
        compiler_params=pltpu.CompilerParams(
            dimension_semantics=("parallel",),
            vmem_limit_bytes=_VMEM_LIMIT),
    )(z, emb, gamma_g, l1, basis, beta_w, beta_b, awz, awe, alpha_b)


# ----------------------------------------------------------------------------
# Kernel 3: fused loss — belong @ [X_recon | mu | add], K-tiled over spots,
#           Poisson + feature losses per step-1 cell row (mean-reduced in XLA).
# ----------------------------------------------------------------------------
def loss_kernel(belong_ref, counts_ref, libra_ref, rhs_ref, o_ref, acc_ref,
                *, g, coef_fe):
    k = pl.program_id(1)

    @pl.when(k == 0)
    def _():
        acc_ref[...] = jnp.zeros_like(acc_ref)

    acc_ref[...] += jnp.dot(belong_ref[...], rhs_ref[...],
                            preferred_element_type=jnp.float32)       # (tm, 3G)

    @pl.when(k == pl.num_programs(1) - 1)
    def _():
        ms = acc_ref[...]
        recon, mu, add = ms[:, :g], ms[:, g:2 * g], ms[:, 2 * g:]
        counts = counts_ref[...]
        libra = libra_ref[...]
        diff = counts - recon
        feat_row = jnp.sqrt(jnp.sum(diff * diff, axis=1, keepdims=True))   # (tm, 1)
        log_lam = jnp.log(mu + 1e-6) + add
        lam = jnp.exp(log_lam)
        term = counts * (jnp.log(libra + 1e-6) + log_lam) - libra * lam
        decon_row = jnp.sum(term, axis=1, keepdims=True)                   # (tm, 1)
        o_ref[...] = coef_fe * feat_row - decon_row                        # per-row partial


def loss_layer(belong, counts, libra, rhs, *, g, coef_fe, tile=256):
    m, n = belong.shape
    tm = _pick_tile(m, tile, 8)
    tk = _pick_tile(n, tile, 128)      # lane dim of the streamed belong block
    return pl.pallas_call(
        functools.partial(loss_kernel, g=g, coef_fe=float(coef_fe)),
        out_shape=jax.ShapeDtypeStruct((m, 1), jnp.float32),
        grid=(m // tm, n // tk),
        in_specs=[
            pl.BlockSpec((tm, tk), lambda i, k: (i, k)),      # belong block (streamed)
            pl.BlockSpec((tm, g), lambda i, k: (i, 0)),       # counts (resident across k)
            pl.BlockSpec((tm, 1), lambda i, k: (i, 0)),       # library sizes
            pl.BlockSpec((tk, 3 * g), lambda i, k: (k, 0)),   # [X_recon | mu | add] K-block
        ],
        out_specs=pl.BlockSpec((tm, 1), lambda i, k: (i, 0)),
        scratch_shapes=[pltpu.VMEM((tm, 3 * g), jnp.float32)],
        compiler_params=pltpu.CompilerParams(
            dimension_semantics=("parallel", "arbitrary"),
            vmem_limit_bytes=_VMEM_LIMIT),
    )(belong, counts, libra, rhs)


# ----------------------------------------------------------------------------
# DeconvNet forward (cheap glue / tiny projections in XLA, heavy compute in Pallas)
# ----------------------------------------------------------------------------
def deconvnet_forward(params, adj_matrix, node_feats, count_matrix, slice_label,
                      basis, logit_step1, belong_matrix, feat_step1,
                      counts_step1, libra_size_step1, coef_fe, *, tile=256):
    del count_matrix, feat_step1              # unused by the torch forward as well
    g = node_feats.shape[1]
    m = belong_matrix.shape[0]
    n_heads = params["n_heads"]

    # adjacency is binary in STitch3D (spatial kNN graph + self loops): stream as int8
    adj_mask = (adj_matrix != 0).astype(jnp.int8)

    # encoder: GAT(x, adj) -> ELU -> enc2
    z = gat_dense_layer(node_feats, adj_mask,
                        params["enc1_w"], params["enc1_b"], params["enc1_v"],
                        params["enc2_w"], params["enc2_b"],
                        n_heads=n_heads, tile=tile)

    emb = params["slice_emb"][slice_label]                 # (N, emb)
    gamma_g = params["gamma"][slice_label]                 # (N, G)
    # pre-reduce belong^T @ logit_step1 once -> (N, n_celltypes)
    l1 = jnp.dot(jnp.transpose(belong_matrix), logit_step1, precision=_HIGH)

    # deconvolutioner: beta softmax, alpha, per-spot mu / add
    packed = deconv_layer(z, emb, gamma_g, l1, basis,
                          params["beta_w"], params["beta_b"],
                          params["alpha_w"], params["alpha_b"], tile=tile)

    # decoder: GAT([Z|emb], adj) -> ELU -> dec2
    dec_in = jnp.concatenate([z, emb], axis=1)
    x_recon = gat_dense_layer(dec_in, adj_mask,
                              params["dec1_w"], params["dec1_b"], params["dec1_v"],
                              params["dec2_w"], params["dec2_b"],
                              n_heads=n_heads, tile=tile)

    # single lane-dense RHS for the loss matmul: [X_recon | spot_mu | spot_add]  (N, 3G)
    rhs = jnp.concatenate([x_recon, packed], axis=1)
    per_row = loss_layer(belong_matrix, counts_step1, libra_size_step1, rhs,
                         g=g, coef_fe=coef_fe, tile=tile)
    return jnp.sum(per_row) / m


# ----------------------------------------------------------------------------
# Deterministic parameter init (mirrors module __init__ shapes / init schemes),
# with GAT head weights stacked for the fused kernel.
# ----------------------------------------------------------------------------
def init_params(key, hidden_dims, n_celltypes, n_slices, n_heads, slice_emb_dim):
    g, hd1, hd2 = hidden_dims
    c_head = hd1 // n_heads
    keys = iter(jax.random.split(key, 64))

    def lin(k, c_in, c_out):
        bound = math.sqrt(6.0 / (c_in + c_out))
        w = jax.random.uniform(k, (c_in, c_out), jnp.float32, -bound, bound)
        return w, jnp.zeros((1, c_out), jnp.float32)

    def block_diag_cols(vs):
        nh = len(vs)
        ch = vs[0].shape[0]
        out = jnp.zeros((nh * ch, nh), jnp.float32)
        for k, v in enumerate(vs):
            out = out.at[k * ch:(k + 1) * ch, k].set(v[:, 0])
        return out

    def gat_stack(c_in):
        ws, bs, v0s, v1s = [], [], [], []
        bv = math.sqrt(6.0 / (c_head + 1))
        for _ in range(n_heads):
            w, b = lin(next(keys), c_in, c_head)
            ws.append(w)
            bs.append(b)
            v0s.append(jax.random.uniform(next(keys), (c_head, 1), jnp.float32, -bv, bv))
            v1s.append(jax.random.uniform(next(keys), (c_head, 1), jnp.float32, -bv, bv))
        w = jnp.concatenate(ws, axis=1)                                  # (c_in, hd1)
        b = jnp.concatenate(bs, axis=1)                                  # (1, hd1)
        v01 = jnp.concatenate([block_diag_cols(v0s), block_diag_cols(v1s)], axis=1)
        return w, b, v01

    enc1_w, enc1_b, enc1_v = gat_stack(g)
    enc2_w, enc2_b = lin(next(keys), hd1, hd2)
    dec1_w, dec1_b, dec1_v = gat_stack(hd2 + slice_emb_dim)
    dec2_w, dec2_b = lin(next(keys), hd1, g)
    return dict(
        n_heads=n_heads,
        enc1_w=enc1_w, enc1_b=enc1_b, enc1_v=enc1_v,
        enc2_w=enc2_w, enc2_b=enc2_b,
        dec1_w=dec1_w, dec1_b=dec1_b, dec1_v=dec1_v,
        dec2_w=dec2_w, dec2_b=dec2_b,
        # zero_init layers
        alpha_w=jnp.zeros((hd2 + slice_emb_dim, 1), jnp.float32),
        alpha_b=jnp.zeros((1, 1), jnp.float32),
        beta_w=jnp.zeros((hd2, n_celltypes), jnp.float32),
        beta_b=jnp.zeros((1, n_celltypes), jnp.float32),
        gamma=jnp.zeros((n_slices, g), jnp.float32),
        slice_emb=jax.random.normal(next(keys), (n_slices, slice_emb_dim), jnp.float32),
    )


# ----------------------------------------------------------------------------
if __name__ == "__main__":
    G, hd1, hd2 = 32, 16, 8           # hidden_dims = [n_genes, 16, 8]
    hidden_dims = [G, hd1, hd2]
    n_celltypes = 8
    n_slices = 3
    n_heads = 2
    slice_emb_dim = 8
    coef_fe = 0.5
    N = 16                             # spots (graph nodes)
    M = 24                             # step-1 cells

    key = jax.random.PRNGKey(0)
    k_par, k_adj, k_x, k_cm, k_sl, k_basis, k_log, k_feat, k_cnt, k_lib = (
        jax.random.split(key, 10))

    params = init_params(k_par, hidden_dims, n_celltypes, n_slices, n_heads,
                         slice_emb_dim)

    adj = (jax.random.uniform(k_adj, (N, N)) < 0.3).astype(jnp.float32)
    adj = jnp.maximum(adj, jnp.eye(N, dtype=jnp.float32))              # self loops
    node_feats = jax.random.normal(k_x, (N, G), jnp.float32)
    count_matrix = jax.random.uniform(k_cm, (N, G), jnp.float32) * 5.0  # unused in fwd
    slice_label = jax.random.randint(k_sl, (N,), 0, n_slices)
    basis = jax.random.uniform(k_basis, (n_celltypes, G), jnp.float32) + 0.1
    logit_step1 = jax.random.normal(k_log, (M, n_celltypes), jnp.float32)
    # each step-1 cell belongs to exactly one spot
    belong = jax.nn.one_hot(jnp.arange(M) % N, N, dtype=jnp.float32)   # (M, N)
    feat_step1 = jax.random.normal(k_feat, (M, G), jnp.float32)        # unused in fwd
    counts_step1 = jnp.floor(jax.random.uniform(k_cnt, (M, G)) * 6.0)
    libra_size_step1 = jax.random.uniform(k_lib, (M, 1), jnp.float32) + 0.5

    loss = deconvnet_forward(params, adj, node_feats, count_matrix, slice_label,
                             basis, logit_step1, belong, feat_step1,
                             counts_step1, libra_size_step1, coef_fe,
                             tile=256)
    jax.block_until_ready(loss)
    assert bool(jnp.isfinite(loss))
    print("KERNEL_OK")
</pallas_src>

<mosaic_0001>
module attributes {stable_mosaic.version = 11 : i64} {
  func.func @gat_attn_dense_kernel(%arg0: i32, %arg1: memref<16x2xf32, #tpu.memory_space<vmem>>, %arg2: memref<2x16xf32, #tpu.memory_space<vmem>>, %arg3: memref<16x16xi8, #tpu.memory_space<vmem>>, %arg4: memref<16x16xf32, #tpu.memory_space<vmem>>, %arg5: memref<16x8xf32, #tpu.memory_space<vmem>>, %arg6: memref<1x8xf32, #tpu.memory_space<vmem>>, %arg7: memref<16x8xf32, #tpu.memory_space<vmem>>) attributes {dimension_semantics = [#tpu.dimension_semantics<parallel>], iteration_bounds = array<i64: 1>, scalar_prefetch = 0 : i64, scratch_operands = 0 : i64, tpu.core_type = #tpu.core_type<tc>, window_params = [{transform_indices = @transform_0, window_bounds = array<i64: 16, 2>}, {pipeline_mode = #tpu.pipeline_mode<synchronous>, transform_indices = @transform_1, window_bounds = array<i64: 2, 16>}, {transform_indices = @transform_2, window_bounds = array<i64: 16, 16>}, {pipeline_mode = #tpu.pipeline_mode<synchronous>, transform_indices = @transform_3, window_bounds = array<i64: 16, 16>}, {pipeline_mode = #tpu.pipeline_mode<synchronous>, transform_indices = @transform_4, window_bounds = array<i64: 16, 8>}, {pipeline_mode = #tpu.pipeline_mode<synchronous>, transform_indices = @transform_5, window_bounds = array<i64: 1, 8>}, {transform_indices = @transform_6, window_bounds = array<i64: 16, 8>}]} {
    %c0 = arith.constant 0 : index
    %c0_0 = arith.constant 0 : index
    %0 = vector.load %arg3[%c0, %c0_0] : memref<16x16xi8, #tpu.memory_space<vmem>>, vector<16x16xi8>
    %c0_i8 = arith.constant 0 : i8
    %1 = vector.broadcast %c0_i8 : i8 to vector<16x16xi8>
    %2 = arith.cmpi ne, %0, %1 : vector<16x16xi8>
    %c0_1 = arith.constant 0 : index
    %c0_2 = arith.constant 0 : index
    %3 = vector.load %arg4[%c0_1, %c0_2] : memref<16x16xf32, #tpu.memory_space<vmem>>, vector<16x16xf32>
    %c0_3 = arith.constant 0 : index
    %c0_4 = arith.constant 0 : index
    %4 = vector.load %arg1[%c0_3, %c0_4] : memref<16x2xf32, #tpu.memory_space<vmem>>, vector<16x2xf32>
    %c0_5 = arith.constant 0 : index
    %c0_6 = arith.constant 0 : index
    %5 = vector.load %arg2[%c0_5, %c0_6] : memref<2x16xf32, #tpu.memory_space<vmem>>, vector<2x16xf32>
    %6 = vector.extract_strided_slice %4 {offsets = [0, 0], sizes = [16, 1], strides = [1, 1]} : vector<16x2xf32> to vector<16x1xf32>
    %7 = vector.extract_strided_slice %5 {offsets = [0, 0], sizes = [1, 16], strides = [1, 1]} : vector<2x16xf32> to vector<1x16xf32>
    %8 = vector.broadcast %6 : vector<16x1xf32> to vector<16x16xf32>
    %9 = vector.broadcast %7 : vector<1x16xf32> to vector<16x16xf32>
    %10 = arith.addf %8, %9 : vector<16x16xf32>
    %11 = arith.negf %10 : vector<16x16xf32>
    %12 = math.exp %11 : vector<16x16xf32>
    %cst = arith.constant 1.000000e+00 : f32
    %13 = vector.broadcast %cst : f32 to vector<16x16xf32>
    %14 = arith.addf %13, %12 : vector<16x16xf32>
    %15 = arith.divf %13, %14 : vector<16x16xf32>
    %cst_7 = arith.constant 5.000000e-01 : f32
    %16 = vector.broadcast %cst_7 : f32 to vector<16x16xf32>
    %17 = arith.subf %15, %16 : vector<16x16xf32>
    %cst_8 = arith.constant 0.000000e+00 : f32
    %18 = vector.broadcast %cst_8 : f32 to vector<16x16xf32>
    %19 = arith.cmpf one, %17, %18 : vector<16x16xf32>
    %20 = arith.andi %2, %19 : vector<16x16xi1>
    %cst_9 = arith.constant 1.000000e+00 : f32
    %21 = vector.broadcast %cst_9 : f32 to vector<16x16xf32>
    %22 = arith.mulf %17, %21 : vector<16x16xf32>
    %23 = math.exp %22 : vector<16x16xf32>
    %cst_10 = arith.constant 0.000000e+00 : f32
    %24 = vector.broadcast %cst_10 : f32 to vector<16x16xf32>
    %25 = arith.select %20, %23, %24 : vector<16x16xi1>, vector<16x16xf32>
    %cst_11 = arith.constant dense<0.000000e+00> : vector<16xf32>
    %26 = vector.multi_reduction <add>, %25, %cst_11 [1] : vector<16x16xf32> to vector<16xf32>
    %27 = vector.shape_cast %26 : vector<16xf32> to vector<16x1xf32>
    %cst_12 = arith.constant 0.000000e+00 : f32
    %28 = vector.broadcast %cst_12 : f32 to vector<16x1xf32>
    %29 = arith.cmpf oeq, %27, %28 : vector<16x1xf32>
    %cst_13 = arith.constant 1.000000e+00 : f32
    %30 = vector.broadcast %cst_13 : f32 to vector<16x1xf32>
    %31 = arith.select %29, %30, %27 : vector<16x1xi1>, vector<16x1xf32>
    %32 = tpu.reciprocal %31 {approx = true} : vector<16x1xf32> -> vector<16x1xf32>
    %33 = vector.broadcast %32 : vector<16x1xf32> to vector<16x16xf32>
    %34 = arith.mulf %25, %33 : vector<16x16xf32>
    %35 = vector.extract_strided_slice %3 {offsets = [0, 0], sizes = [16, 8], strides = [1, 1]} : vector<16x16xf32> to vector<16x8xf32>
    %cst_14 = arith.constant dense<0.000000e+00> : vector<16x8xf32>
    %36 = tpu.matmul %34, %35, %cst_14 {dimension_numbers = #tpu.dot_dimension_numbers<[1], [0], [0], [1], [0, 0, 1, 1], [], []>} : vector<16x16xf32>, vector<16x8xf32>, vector<16x8xf32> -> vector<16x8xf32>
    %cst_15 = arith.constant 0.000000e+00 : f32
    %37 = vector.broadcast %cst_15 : f32 to vector<16x8xf32>
    %38 = arith.cmpf ogt, %36, %37 : vector<16x8xf32>
    %cst_16 = arith.constant 0.000000e+00 : f32
    %39 = vector.broadcast %cst_16 : f32 to vector<16x8xf32>
    %40 = arith.minimumf %36, %39 : vector<16x8xf32>
    %41 = math.exp %40 : vector<16x8xf32>
    %cst_17 = arith.constant 1.000000e+00 : f32
    %42 = vector.broadcast %cst_17 : f32 to vector<16x8xf32>
    %43 = arith.subf %41, %42 : vector<16x8xf32>
    %44 = arith.select %38, %36, %43 : vector<16x8xi1>, vector<16x8xf32>
    %c0_18 = arith.constant 0 : index
    %c0_19 = arith.constant 0 : index
    %45 = vector.load %arg5[%c0_18, %c0_19] : memref<16x8xf32, #tpu.memory_space<vmem>>, vector<8x8xf32>
    %cst_20 = arith.constant dense<0.000000e+00> : vector<16x8xf32>
    %46 = tpu.matmul %44, %45, %cst_20 {dimension_numbers = #tpu.dot_dimension_numbers<[1], [0], [0], [1], [0, 0, 1, 1], [], []>} : vector<16x8xf32>, vector<8x8xf32>, vector<16x8xf32> -> vector<16x8xf32>
    %47 = vector.extract_strided_slice %4 {offsets = [0, 1], sizes = [16, 1], strides = [1, 1]} : vector<16x2xf32> to vector<16x1xf32>
    %48 = vector.extract_strided_slice %5 {offsets = [1, 0], sizes = [1, 16], strides = [1, 1]} : vector<2x16xf32> to vector<1x16xf32>
    %49 = vector.broadcast %47 : vector<16x1xf32> to vector<16x16xf32>
    %50 = vector.broadcast %48 : vector<1x16xf32> to vector<16x16xf32>
    %51 = arith.addf %49, %50 : vector<16x16xf32>
    %52 = arith.negf %51 : vector<16x16xf32>
    %53 = math.exp %52 : vector<16x16xf32>
    %cst_21 = arith.constant 1.000000e+00 : f32
    %54 = vector.broadcast %cst_21 : f32 to vector<16x16xf32>
    %55 = arith.addf %54, %53 : vector<16x16xf32>
    %56 = arith.divf %54, %55 : vector<16x16xf32>
    %cst_22 = arith.constant 5.000000e-01 : f32
    %57 = vector.broadcast %cst_22 : f32 to vector<16x16xf32>
    %58 = arith.subf %56, %57 : vector<16x16xf32>
    %cst_23 = arith.constant 0.000000e+00 : f32
    %59 = vector.broadcast %cst_23 : f32 to vector<16x16xf32>
    %60 = arith.cmpf one, %58, %59 : vector<16x16xf32>
    %61 = arith.andi %2, %60 : vector<16x16xi1>
    %cst_24 = arith.constant 1.000000e+00 : f32
    %62 = vector.broadcast %cst_24 : f32 to vector<16x16xf32>
    %63 = arith.mulf %58, %62 : vector<16x16xf32>
    %64 = math.exp %63 : vector<16x16xf32>
    %cst_25 = arith.constant 0.000000e+00 : f32
    %65 = vector.broadcast %cst_25 : f32 to vector<16x16xf32>
    %66 = arith.select %61, %64, %65 : vector<16x16xi1>, vector<16x16xf32>
    %cst_26 = arith.constant dense<0.000000e+00> : vector<16xf32>
    %67 = vector.multi_reduction <add>, %66, %cst_26 [1] : vector<16x16xf32> to vector<16xf32>
    %68 = vector.shape_cast %67 : vector<16xf32> to vector<16x1xf32>
    %cst_27 = arith.constant 0.000000e+00 : f32
    %69 = vector.broadcast %cst_27 : f32 to vector<16x1xf32>
    %70 = arith.cmpf oeq, %68, %69 : vector<16x1xf32>
    %cst_28 = arith.constant 1.000000e+00 : f32
    %71 = vector.broadcast %cst_28 : f32 to vector<16x1xf32>
    %72 = arith.select %70, %71, %68 : vector<16x1xi1>, vector<16x1xf32>
    %73 = tpu.reciprocal %72 {approx = true} : vector<16x1xf32> -> vector<16x1xf32>
    %74 = vector.broadcast %73 : vector<16x1xf32> to vector<16x16xf32>
    %75 = arith.mulf %66, %74 : vector<16x16xf32>
    %76 = vector.extract_strided_slice %3 {offsets = [0, 8], sizes = [16, 8], strides = [1, 1]} : vector<16x16xf32> to vector<16x8xf32>
    %cst_29 = arith.constant dense<0.000000e+00> : vector<16x8xf32>
    %77 = tpu.matmul %75, %76, %cst_29 {dimension_numbers = #tpu.dot_dimension_numbers<[1], [0], [0], [1], [0, 0, 1, 1], [], []>} : vector<16x16xf32>, vector<16x8xf32>, vector<16x8xf32> -> vector<16x8xf32>
    %cst_30 = arith.constant 0.000000e+00 : f32
    %78 = vector.broadcast %cst_30 : f32 to vector<16x8xf32>
    %79 = arith.cmpf ogt, %77, %78 : vector<16x8xf32>
    %cst_31 = arith.constant 0.000000e+00 : f32
    %80 = vector.broadcast %cst_31 : f32 to vector<16x8xf32>
    %81 = arith.minimumf %77, %80 : vector<16x8xf32>
    %82 = math.exp %81 : vector<16x8xf32>
    %cst_32 = arith.constant 1.000000e+00 : f32
    %83 = vector.broadcast %cst_32 : f32 to vector<16x8xf32>
    %84 = arith.subf %82, %83 : vector<16x8xf32>
    %85 = arith.select %79, %77, %84 : vector<16x8xi1>, vector<16x8xf32>
    %c8 = arith.constant 8 : index
    %c0_33 = arith.constant 0 : index
    %86 = vector.load %arg5[%c8, %c0_33] : memref<16x8xf32, #tpu.memory_space<vmem>>, vector<8x8xf32>
    %cst_34 = arith.constant dense<0.000000e+00> : vector<16x8xf32>
    %87 = tpu.matmul %85, %86, %cst_34 {dimension_numbers = #tpu.dot_dimension_numbers<[1], [0], [0], [1], [0, 0, 1, 1], [], []>} : vector<16x8xf32>, vector<8x8xf32>, vector<16x8xf32> -> vector<16x8xf32>
    %88 = arith.addf %46, %87 : vector<16x8xf32>
    %c0_35 = arith.constant 0 : index
    %c0_36 = arith.constant 0 : index
    %89 = vector.load %arg6[%c0_35, %c0_36] : memref<1x8xf32, #tpu.memory_space<vmem>>, vector<1x8xf32>
    %90 = vector.broadcast %89 : vector<1x8xf32> to vector<16x8xf32>
    %91 = arith.addf %88, %90 : vector<16x8xf32>
    %c0_37 = arith.constant 0 : index
    %c0_38 = arith.constant 0 : index
    %92 = vector.load %arg7[%c0_37, %c0_38] : memref<16x8xf32, #tpu.memory_space<vmem>>, vector<16x8xf32>
    tpu.vector_store %arg7[%c0_37, %c0_38], %91 {strides = array<i32>} : memref<16x8xf32, #tpu.memory_space<vmem>>, vector<16x8xf32>,
    return
  }
  func.func @transform_0(%arg0: i32) -> (i32, i32) {
    %c0_i32 = arith.constant 0 : i32
    %c0_i32_0 = arith.constant 0 : i32
    return %arg0, %c0_i32 : i32, i32
  }
  func.func @transform_1(%arg0: i32) -> (i32, i32) {
    %c0_i32 = arith.constant 0 : i32
    %c0_i32_0 = arith.constant 0 : i32
    %c0_i32_1 = arith.constant 0 : i32
    return %c0_i32, %c0_i32_0 : i32, i32
  }
  func.func @transform_2(%arg0: i32) -> (i32, i32) {
    %c0_i32 = arith.constant 0 : i32
    %c0_i32_0 = arith.constant 0 : i32
    return %arg0, %c0_i32 : i32, i32
  }
  func.func @transform_3(%arg0: i32) -> (i32, i32) {
    %c0_i32 = arith.constant 0 : i32
    %c0_i32_0 = arith.constant 0 : i32
    %c0_i32_1 = arith.constant 0 : i32
    return %c0_i32, %c0_i32_0 : i32, i32
  }
  func.func @transform_4(%arg0: i32) -> (i32, i32) {
    %c0_i32 = arith.constant 0 : i32
    %c0_i32_0 = arith.constant 0 : i32
    %c0_i32_1 = arith.constant 0 : i32
    return %c0_i32, %c0_i32_0 : i32, i32
  }
  func.func @transform_5(%arg0: i32) -> (i32, i32) {
    %c0_i32 = arith.constant 0 : i32
    %c0_i32_0 = arith.constant 0 : i32
    %c0_i32_1 = arith.constant 0 : i32
    return %c0_i32, %c0_i32_0 : i32, i32
  }
  func.func @transform_6(%arg0: i32) -> (i32, i32) {
    %c0_i32 = arith.constant 0 : i32
    %c0_i32_0 = arith.constant 0 : i32
    return %arg0, %c0_i32 : i32, i32
  }
}

</mosaic_0001>

<bundles_post_ra>
// kernel: tpu_custom_call.1
= control target key start
LH: loop header
LB: loop body
LE: loop exit
PB: predicated region body
PF: predicated region fallthrough
CT: control target
= control target key end

     0   :  { %v655_v0 = vmov 1   ;;  %v656_v1 = vmov 0   ;;  %v44_v4 = vlaneseq  ;;  %s657_s8 = smov 120   ;;  %s757_s0 = inlined_call_operand.vmem [shape: f32[16,2], index: 0, kind: input, shape index: {}]   ;;  %s758_s1 = inlined_call_operand.vmem [shape: f32[2,16], index: 1, kind: input, shape index: {}]   ;;  %s759_s2 = inlined_call_operand.vmem [shape: s8[16,16], index: 2, kind: input, shape index: {}]   ;;  %s760_s3 = inlined_call_operand.vmem [shape: f32[16,16], index: 3, kind: input, shape index: {}]   ;;  %s761_s4 = inlined_call_operand.vmem [shape: f32[16,8], index: 4, kind: input, shape index: {}]   ;;  %s762_s5 = inlined_call_operand.vmem [shape: f32[1,8], index: 5, kind: input, shape index: {}]   ;;  %s763_s6 = inlined_call_operand.vmem [shape: f32[16,8], index: 6, kind: output, shape index: {}]  }
   0x1   :  { %608 = vset.pattern.permute.xlu1 %v655_v0  ;;  %607 = vset.pattern.permute.xlu0 %v656_v1  ;;  %v31_v2 = vld [vmem:[%s757_s0] sm:$0xff]  ;;  %v32_v3 = vld [vmem:[%s757_s0 + $0x8] sm:$0xff] }
   0x2   :  { %194 = vperm.xlu1 %608, %v31_v2   ;;  %36 = vperm.xlu0 %607, %v31_v2   ;;  %v45_v5 = vshrl.u32 %v44_v4, 7  ;;  %v33_v8 = vld [vmem:[%s758_s1] sm:$0x3]  ;;  %v26_v43 = vld [vmem:[%s759_s2 + $0x2] sm:$0x3] }
   0x3   :  { %v25_v34 = vld [vmem:[%s759_s2] sm:$0x3]  ;;  %vm28_vm10 = vnez %v26_v43 }
   0x4   :  { %v203_v6 = vsub.s32 1, %v45_v5  ;;  %v46_v7 = vsub.s32 0, %v45_v5  ;;  %vm27_vm1 = vnez %v25_v34  ;;  %v29_v2 = vld [vmem:[%s760_s3] sm:$0xff] }
   0x6   :  { %198 = vperm.xlu1 %608, %v32_v3   ;;  %41 = vperm.xlu0 %607, %v32_v3   ;;  %v204_v9 = vrot.slane %v33_v8, %v203_v6  ;;  %v47_v10 = vrot.slane %v33_v8, %v46_v7  ;;  %v30_v3 = vld [vmem:[%s760_s3 + $0x8] sm:$0xff] }
   0x7   :  { %v609_v4 = vpack.i.bf16 %v30_v3, %v29_v2  ;;  %v594_v5 = vpack.c.bf16 %v30_v3, %v29_v2 }
   0x9   :  { %595 = vmatprep.subr.bf16.mxu1 %v594_v5 }
   0xa   :  { %614 = vset.pattern.permute.xlu0 %v655_v0  ;;  %597 = vmatpush3.bf16.msra.mxu1 %v594_v5 }
  0x81   :  { %v195_v11 = vpop.permute.xlu1 %194  ;;  %v37_v12 = vpop.permute.xlu0 %36 }
  0x82   :  { %v205_v13 = vadd.f32 %v204_v9, %v195_v11  ;;  %v48_v14 = vadd.f32 %v47_v10, %v37_v12 }
  0x84   :  { %v543_v15 = vmul.f32 -1.442695, %v205_v13  ;;  %v535_v16 = vmul.f32 -1.442695, %v48_v14 }
  0x85   :  { %v199_v17 = vpop.permute.xlu1 %198  ;;  %v42_v18 = vpop.permute.xlu0 %41 }
  0x86   :  { %615 = vpow2.f32 %v543_v15  ;;  %v206_v19 = vadd.f32 %v204_v9, %v199_v17  ;;  %v49_v20 = vadd.f32 %v47_v10, %v42_v18 }
  0x87   :  { %617 = vpow2.f32 %v535_v16 }
  0x88   :  { %v544_v21 = vmul.f32 -1.442695, %v206_v19  ;;  %v536_v22 = vmul.f32 -1.442695, %v49_v20 }
  0x8a   :  { %619 = vpow2.f32 %v544_v21 }
  0x8b   :  { %621 = vpow2.f32 %v536_v22 }
  0x90   :  { %v616_v23 = vpop.eup %615 }
  0x91   :  { %v618_v24 = vpop.eup %617  ;;  %v213_v25 = vadd.f32 1.0, %v616_v23 }
  0x92   :  { %v56_v26 = vadd.f32 1.0, %v618_v24 }
  0x93   :  { %623 = vrcp.f32 %v213_v25 }
  0x94   :  { %v620_v27 = vpop.eup %619  ;;  %625 = vrcp.f32 %v56_v26  ;;  %v356_v26 = vld [vmem:[%s761_s4 + $0x8] sm:$0xff] }
  0x95   :  { %v622_v28 = vpop.eup %621  ;;  %v214_v29 = vadd.f32 1.0, %v620_v27  ;;  %584 = vmatprep.subr.mxu0 %v356_v26  ;;  %v192_v27 = vld [vmem:[%s761_s4] sm:$0xff] }
  0x96   :  { %v57_v30 = vadd.f32 1.0, %v622_v28  ;;  %585 = vmatpush3.msra.mxu0 %v356_v26 }
  0x97   :  { %627 = vrcp.f32 %v214_v29  ;;  %589 = vmatprep.subr.mxu0 %v192_v27 }
  0x98   :  { %629 = vrcp.f32 %v57_v30 }
  0x9d   :  { %v624_v31 = vpop.eup %623 }
  0x9e   :  { %v626_v32 = vpop.eup %625  ;;  %v545_v33 = vadd.f32 -0.5, %v624_v31 }
  0x9f   :  { %v537_v35 = vadd.f32 -0.5, %v626_v32 }
  0xa0   :  { %v229_v36 = vmul.f32 1.442695, %v545_v33  ;;  %vm221_vm0 = vcmp.ne.f32.partialorder %v545_v33, 0.0 }
  0xa1   :  { %v628_v37 = vpop.eup %627  ;;  %v72_v38 = vmul.f32 1.442695, %v537_v35  ;;  %vm64_vm2 = vcmp.ne.f32.partialorder %v537_v35, 0.0  ;;  %vm706_vm3 = vmpackc.low %vm221_vm0, %vm221_vm0 }
  0xa2   :  { %v630_v40 = vpop.eup %629  ;;  %631 = vpow2.f32 %v229_v36  ;;  %v546_v41 = vadd.f32 -0.5, %v628_v37  ;;  %vm66_vm4 = vmpackc.low %vm64_vm2, %vm64_vm2  ;;  %vm84_vm2 = vcmask 130048  }
  0xa3   :  { %633 = vpow2.f32 %v72_v38  ;;  %v538_v42 = vadd.f32 -0.5, %v630_v40  ;;  %vm67_vm5 = vmpackc.even %vm66_vm4, %vm66_vm4 }
  0xa4   :  { %v231_v44 = vmul.f32 1.442695, %v546_v41  ;;  %vm70_vm6 = vmand %vm27_vm1, %vm67_vm5  ;;  %vm222_vm12 = vcmp.ne.f32.partialorder %v546_v41, 0.0 }
  0xa5   :  { %v74_v45 = vmul.f32 1.442695, %v538_v42  ;;  %vm224_vm7 = vmpackc.even %vm706_vm3, %vm706_vm3  ;;  %vm65_vm8 = vcmp.ne.f32.partialorder %v538_v42, 0.0  ;;  %v76_v46 = vsel %vm70_vm6, 16843009, %v656_v1 }
  0xa6   :  { %635 = vpow2.f32 %v231_v44  ;;  %vm227_vm9 = vmand %vm27_vm1, %vm224_vm7  ;;  %v78_v48 = vunpack.c.0.s8 %v76_v46 }
  0xa7   :  { %637 = vpow2.f32 %v74_v45  ;;  %v233_v47 = vsel %vm227_vm9, 16843009, %v656_v1  ;;  %vm68_vm11 = vmpackc.low %vm65_vm8, %vm65_vm8 }
  0xa8   :  { %vm69_vm13 = vmpackc.even %vm68_vm11, %vm68_vm11  ;;  %v235_v49 = vunpack.c.0.s8 %v233_v47  ;;  %vm80_vm4 = vcmp.ne.s32.totalorder %v78_v48, 0  ;;  %vm357_vm11 = vcmask 64512  }
  0xa9   :  { %vm71_vm14 = vmand %vm28_vm10, %vm69_vm13 }
  0xaa   :  { %v77_v50 = vsel %vm71_vm14, 16843009, %v656_v1  ;;  %vm225_vm15 = vmpackc.low %vm222_vm12, %vm222_vm12  ;;  %vm237_vm1 = vcmp.ne.s32.totalorder %v235_v49, 0 }
  0xab   :  { %vm226_vm0 = vmpackc.even %vm225_vm15, %vm225_vm15  ;;  %v79_v53 = vunpack.c.0.s8 %v77_v50 }
  0xac   :  { %v632_v51 = vpop.eup %631  ;;  %vm228_vm3 = vmand %vm28_vm10, %vm226_vm0 }
  0xad   :  { %v634_v52 = vpop.eup %633  ;;  %v234_v54 = vsel %vm228_vm3, 16843009, %v656_v1  ;;  %v239_v59 = vsel %vm237_vm1, %v632_v51, 0.0  ;;  %vm81_vm5 = vcmp.ne.s32.totalorder %v79_v53, 0 }
  0xae   :  { %v82_v55 = vsel %vm80_vm4, %v634_v52, 0.0  ;;  %v236_v57 = vunpack.c.0.s8 %v234_v54  ;;  %v241_v62 = vsel %vm84_vm2, %v239_v59, 0.0  ;;  %v555_v52 = vld [vmem:[%s762_s5] ss:$0 sm:$0xff] }
  0xaf   :  { %v85_v56 = vsel %vm84_vm2, %v82_v55, 0.0 }
  0xb0   :  { %v636_v58 = vpop.eup %635  ;;  %86 = vadd.xlane.f32.xlu0 %v85_v56  ;;  %vm238_vm6 = vcmp.ne.s32.totalorder %v236_v57, 0 }
  0xb1   :  { %v638_v60 = vpop.eup %637  ;;  %v240_v0 = vsel %vm238_vm6, %v636_v58, 0.0 }
  0xb2   :  { %v83_v61 = vsel %vm81_vm5, %v638_v60, 0.0  ;;  %v244_v1 = vsel %vm84_vm2, %v240_v0, 0.0 }
  0xb3   :  { %v88_v63 = vsel %vm84_vm2, %v83_v61, 0.0 }
  0xb4   :  { %242 = vadd.xlane.f32.xlu0 %v241_v62  ;;  %89 = vadd.xlane.f32.xlu1 %v88_v63 }
  0xb8   :  { %245 = vadd.xlane.f32.xlu0 %v244_v1 }
  0xc5   :  { %610 = vrot.lane.b32.xlu1 %v609_v4, %s657_s8 }
 0x13d   :  { %v87_v6 = vpop.xlane.xlu0 %86 }
 0x13e   :  { %vm91_vm7 = vcmp.eq.f32.partialorder %v87_v6, 0.0 }
 0x13f   :  { %v93_v7 = vsel %vm91_vm7, 1.0, %v87_v6 }
 0x140   :  { %639 = vrcp.f32 %v93_v7 }
 0x141   :  { %v90_v8 = vpop.xlane.xlu1 %89  ;;  %v243_v9 = vpop.xlane.xlu0 %242 }
 0x142   :  { %vm92_vm8 = vcmp.eq.f32.partialorder %v90_v8, 0.0  ;;  %vm247_vm9 = vcmp.eq.f32.partialorder %v243_v9, 0.0 }
 0x143   :  { %v94_v10 = vsel %vm92_vm8, 1.0, %v90_v8  ;;  %v249_v11 = vsel %vm247_vm9, 1.0, %v243_v9 }
 0x144   :  { %641 = vrcp.f32 %v94_v10 }
 0x145   :  { %643 = vrcp.f32 %v249_v11  ;;  %v246_v12 = vpop.xlane.xlu0 %245  ;;  %v611_v13 = vpop.permute.xlu1 %610 }
 0x146   :  { %vm248_vm10 = vcmp.eq.f32.partialorder %v246_v12, 0.0  ;;  %v613_v14 = vunpack.i.h.bf16 %v611_v13  ;;  %v612_v15 = vunpack.i.l.bf16 %v611_v13 }
 0x147   :  { %v250_v16 = vsel %vm248_vm10, 1.0, %v246_v12 }
 0x148   :  { %645 = vrcp.f32 %v250_v16  ;;  %v598_v17 = vpack.c.bf16 %v613_v14, %v612_v15 }
 0x14a   :  { %v640_v18 = vpop.eup %639  ;;  %599 = vmatprep.subr.bf16.mxu1 %v598_v17 }
 0x14b   :  { %v97_v19 = vmul.f32 %v640_v18, %v82_v55 }
 0x14d   :  { %574 = vmatprep.mubr.msk.f32.mxu1 %vm84_vm2, %v97_v19 }
 0x14e   :  { %v642_v20 = vpop.eup %641 }
 0x14f   :  { %v644_v21 = vpop.eup %643  ;;  %v98_v22 = vmul.f32 %v642_v20, %v83_v61 }
 0x150   :  { %v253_v23 = vmul.f32 %v644_v21, %v239_v59 }
 0x151   :  { %575 = vmatmul.mubr.msk.f32.vlgmr.msra.gmra.mrb[0].mxu1 %vm84_vm2, %v98_v22 }
 0x152   :  { %v646_v24 = vpop.eup %645  ;;  %601 = vmatpush3.bf16.msra.mxu1 %v598_v17  ;;  %581 = vmatprep.mubr.msk.f32.mxu1 %vm84_vm2, %v253_v23 }
 0x153   :  { %v254_v25 = vmul.f32 %v646_v24, %v240_v0 }
 0x155   :  { %582 = vmatmul.mubr.msk.f32.vlgmr.msra.gmra.mrb[2].mxu1 %vm84_vm2, %v254_v25 }
 0x224   :  { %v576_v28 = vpop.f32.mrb[0].mxu1 }
 0x225   :  { %v171_v29 = vpop.f32.mrb[1].mxu1  ;;  %v183_v36 = vmin.f32 %v576_v28, 0.0  ;;  %vm181_vm15 = vcmp.gt.f32.partialorder %v576_v28, 0.0 }
 0x226   :  { %v182_v30 = vmin.f32 %v171_v29, 0.0  ;;  %vm180_vm14 = vcmp.gt.f32.partialorder %v171_v29, 0.0 }
 0x227   :  { %v186_v39 = vmul.f32 1.442695, %v183_v36 }
 0x228   :  { %v184_v31 = vmul.f32 1.442695, %v182_v30  ;;  %v583_v32 = vpop.f32.mrb[2].mxu1 }
 0x229   :  { %v347_v33 = vmin.f32 %v583_v32, 0.0  ;;  %v335_v34 = vpop.f32.mrb[3].mxu1  ;;  %vm345_vm13 = vcmp.gt.f32.partialorder %v583_v32, 0.0 }
 0x22a   :  { %v346_v35 = vmin.f32 %v335_v34, 0.0  ;;  %647 = vpow2.f32 %v184_v31  ;;  %vm344_vm12 = vcmp.gt.f32.partialorder %v335_v34, 0.0 }
 0x22b   :  { %v350_v37 = vmul.f32 1.442695, %v347_v33 }
 0x22c   :  { %v348_v38 = vmul.f32 1.442695, %v346_v35 }
 0x22d   :  { %649 = vpow2.f32 %v350_v37 }
 0x22e   :  { %651 = vpow2.f32 %v348_v38 }
 0x22f   :  { %653 = vpow2.f32 %v186_v39 }
 0x234   :  { %v648_v40 = vpop.eup %647 }
 0x235   :  { %v541_v44 = vadd.f32 -1.0, %v648_v40 }
 0x237   :  { %v650_v41 = vpop.eup %649  ;;  %v190_v49 = vsel %vm180_vm14, %v171_v29, %v541_v44 }
 0x238   :  { %v652_v42 = vpop.eup %651  ;;  %v550_v43 = vadd.f32 -1.0, %v650_v41 }
 0x239   :  { %v549_v45 = vadd.f32 -1.0, %v652_v42  ;;  %v654_v48 = vpop.eup %653 }
 0x23a   :  { %v355_v47 = vsel %vm345_vm13, %v583_v32, %v550_v43  ;;  %v542_v50 = vadd.f32 -1.0, %v654_v48 }
 0x23b   :  { %v354_v46 = vsel %vm344_vm12, %v335_v34, %v549_v45 }
 0x23c   :  { %586 = vmatprep.mubr.msk.f32.mxu0 %vm357_vm11, %v354_v46  ;;  %v191_v51 = vsel %vm181_vm15, %v576_v28, %v542_v50 }
 0x23d   :  { %587 = vmatmul.mubr.msk.f32.vlgmr.msra.gmra.mrb[0].mxu0 %vm357_vm11, %v355_v47 }
 0x23e   :  { %590 = vmatpush3.msra.mxu0 %v192_v27  ;;  %591 = vmatprep.mubr.msk.f32.mxu0 %vm357_vm11, %v190_v49 }
 0x245   :  { %592 = vmatmul.mubr.msk.f32.vlgmr.msra.gmra.mrb[0].mxu0 %vm357_vm11, %v191_v51 }
 0x318   :  { %v593_v53 = vpop.f32.mrb[0].mxu0 }
 0x319   :  { %v528_v54 = vadd.f32 %v593_v53, %v555_v52  ;;  %v511_v55 = vpop.f32.mrb[1].mxu0 }
 0x31a   :  { %v527_v56 = vadd.f32 %v555_v52, %v511_v55 }
 0x31b   :  { %530 = vst.msk [vmem:[%s763_s6 + $0x8] sm:$0xff] %vm357_vm11, %v528_v54 }
 0x31c   :  { %529 = vst.msk [vmem:[%s763_s6] sm:$0xff] %vm357_vm11, %v527_v56 }

</bundles_post_ra>
